<compile_context>
chip_gen: v5e
topology: v5e:2x2
jax: 0.10.0
libtpu: 0.0.40
codegen_flags: <defaults>
</compile_context>

<pallas_src>
import jax
import jax.numpy as jnp
from jax.experimental import pallas as pl
from jax.experimental.pallas import tpu as pltpu


def _round_up(x, m):
    return ((x + m - 1) // m) * m


def _vmem_info():
    """Physical VMEM capacity (bytes) and the scoped limit we request."""
    try:
        cap = pltpu.get_tpu_info().vmem_capacity_bytes
    except Exception:
        cap = 64 * 1024 * 1024
    limit = max(32 * 1024 * 1024, min(int(cap * 3 // 4), 100 * 1024 * 1024))
    return cap, limit


def make_pasnet_kernel(gene_p, path_p, hid_p, out_p):
    """Builds the kernel with the (128-padded) layer sizes captured statically."""

    def kernel(x_ref, w0_ref, bias_ref, w1_ref, w2_ref, w3_ref, out_ref, acc_ref):
        k = pl.program_id(1)

        @pl.when(k == 0)
        def _():
            acc_ref[...] = jnp.zeros_like(acc_ref)

        # --- layer 0 (masked gene layer): stream K tiles into f32 accumulator.
        acc_ref[...] += jnp.dot(x_ref[...], w0_ref[...],
                                preferred_element_type=jnp.float32)

        @pl.when(k == pl.num_programs(1) - 1)
        def _():
            biases = bias_ref[...]                      # (4, d_max) f32
            b0 = biases[0:1, :gene_p]
            b1 = biases[1:2, :path_p]
            b2 = biases[2:3, :hid_p]
            b3 = biases[3:4, :out_p]                    # pad lanes hold -1e9

            dot_dt = w1_ref.dtype                       # bf16 or f32 (MXU input)

            # Activations stay f32 (v5e VPU/EUP have no bf16 path); only the
            # MXU operands are cast down.
            h0 = jax.nn.sigmoid(acc_ref[...] + b0)                       # (Bt, Gp)
            h1 = jax.nn.sigmoid(
                jnp.dot(h0.astype(dot_dt), w1_ref[...],
                        preferred_element_type=jnp.float32) + b1)        # (Bt, Pp)
            h2 = jax.nn.sigmoid(
                jnp.dot(h1.astype(dot_dt), w2_ref[...],
                        preferred_element_type=jnp.float32) + b2)        # (Bt, Hp)
            logits = jnp.dot(h2.astype(dot_dt), w3_ref[...],
                             preferred_element_type=jnp.float32) + b3    # (Bt, Op)

            # Softmax over lane-padded logits: pad lanes are -1e9 (f32), so
            # they contribute exact zeros.  Exact f32 normalization (one
            # reciprocal per row) so rows sum to 1.
            m = jnp.max(logits, axis=1, keepdims=True)
            e = jnp.exp(logits - m)
            denom = jnp.sum(e, axis=1, keepdims=True)
            out_ref[...] = e * (1.0 / denom)

    return kernel


def prepare_pasnet_params(params, gene_mask, pathway_mask, *,
                          param_dtype=jnp.bfloat16, k_tile=None):
    """One-time (model-load) weight preprocessing.

    Applies the sparsity masks, transposes PyTorch (out,in) -> (in,out),
    zero-pads every dim to a lane-dense multiple of 128, casts MXU operands to
    `param_dtype` and packs the biases.  Doing this once keeps the HBM-bound
    kernel as the only consumer of weight bandwidth at call time.
    """
    gene, in_nodes = params["w0"].shape
    pathway = params["w1"].shape[0]
    hidden = params["w2"].shape[0]
    out = params["w3"].shape[0]

    gene_p = _round_up(gene, 128)
    path_p = _round_up(pathway, 128)
    hid_p = _round_up(hidden, 128)
    out_p = _round_up(out, 128)
    d_max = max(gene_p, path_p, hid_p, out_p)

    vmem_cap, vmem_limit = _vmem_info()
    big_vmem = vmem_cap >= 96 * 1024 * 1024     # v5e/v6e: 128 MiB; v7x: 64 MiB
    if k_tile is None:
        if big_vmem:
            k_tile = 1024
        else:
            k_tile = 512 if jnp.dtype(param_dtype).itemsize <= 2 else 256
    k_tile = min(k_tile, _round_up(in_nodes, 128))
    k_pad = _round_up(in_nodes, k_tile)

    f32 = jnp.float32
    # Masks are binary, so pre-applying them once matches the module's
    # repeated in-place weight masking.
    w0t = (params["w0"] * gene_mask).T.astype(param_dtype)        # (In, Gene)
    w1t = (params["w1"] * pathway_mask).T.astype(param_dtype)     # (Gene, Path)
    w2t = params["w2"].T.astype(param_dtype)                      # (Path, Hid)
    w3t = params["w3"].T.astype(param_dtype)                      # (Hid, Out)

    w0p = jnp.zeros((k_pad, gene_p), param_dtype).at[:in_nodes, :gene].set(w0t)
    w1p = jnp.zeros((gene_p, path_p), param_dtype).at[:gene, :pathway].set(w1t)
    w2p = jnp.zeros((path_p, hid_p), param_dtype).at[:pathway, :hidden].set(w2t)
    w3p = jnp.zeros((hid_p, out_p), param_dtype).at[:hidden, :out].set(w3t)

    # Packed bias buffer (f32).  Row 3's pad lanes are -1e9 so padded softmax
    # columns give exact zeros (safe: logits are accumulated & kept in f32).
    bias_pack = jnp.zeros((4, d_max), f32)
    bias_pack = bias_pack.at[0, :gene].set(params["b0"].astype(f32))
    bias_pack = bias_pack.at[1, :pathway].set(params["b1"].astype(f32))
    bias_pack = bias_pack.at[2, :hidden].set(params["b2"].astype(f32))
    b3_row = jnp.full((d_max,), -1e9, f32).at[:out].set(params["b3"].astype(f32))
    bias_pack = bias_pack.at[3].set(b3_row)

    return dict(
        w0=w0p, w1=w1p, w2=w2p, w3=w3p, bias=bias_pack,
        dims=dict(in_nodes=in_nodes, gene=gene, pathway=pathway, hidden=hidden,
                  out=out, gene_p=gene_p, path_p=path_p, hid_p=hid_p,
                  out_p=out_p, d_max=d_max, k_tile=k_tile, k_pad=k_pad),
        param_dtype=param_dtype, vmem_limit=vmem_limit, big_vmem=big_vmem,
    )


def pasnet_apply(prepared, x, *, b_tile=None):
    """Run the PASNet forward pass on (B, In_Nodes) f32 inputs."""
    B, in_nodes = x.shape
    d = prepared["dims"]
    assert in_nodes == d["in_nodes"]
    param_dtype = prepared["param_dtype"]

    # Batch tiling: bigger tiles raise the arithmetic intensity of the w0
    # stream; keep >=2 tiles when the batch permits so both v7x TensorCores
    # get work on the "parallel" batch axis.
    if b_tile is None:
        b_tile = 512 if prepared["big_vmem"] else 256
    b_tile = min(b_tile, _round_up(B, 8))
    if B >= 16 and _round_up(B, b_tile) // b_tile < 2:
        b_tile = _round_up(-(-B // 2), 8)
    b_pad = _round_up(B, b_tile)

    k_tile, k_pad = d["k_tile"], d["k_pad"]
    nb, nk = b_pad // b_tile, k_pad // k_tile

    xp = jnp.zeros((b_pad, k_pad), param_dtype).at[:B, :in_nodes].set(
        x.astype(param_dtype))

    gene_p, path_p, hid_p, out_p, d_max = (
        d["gene_p"], d["path_p"], d["hid_p"], d["out_p"], d["d_max"])
    kernel = make_pasnet_kernel(gene_p, path_p, hid_p, out_p)

    def run(single_buffer_resident):
        def resident(shape):
            # Grid-invariant operands never change across the grid; single-
            # buffer them to halve their VMEM footprint (critical on v7x).
            if single_buffer_resident:
                return pl.BlockSpec(shape, lambda b, k: (0, 0),
                                    pipeline_mode=pl.Buffered(1))
            return pl.BlockSpec(shape, lambda b, k: (0, 0))

        return pl.pallas_call(
            kernel,
            out_shape=jax.ShapeDtypeStruct((b_pad, out_p), jnp.float32),
            grid_spec=pltpu.PrefetchScalarGridSpec(
                num_scalar_prefetch=0,
                grid=(nb, nk),
                in_specs=[
                    pl.BlockSpec((b_tile, k_tile), lambda b, k: (b, k)),  # x
                    pl.BlockSpec((k_tile, gene_p), lambda b, k: (k, 0)),  # masked w0
                    resident((4, d_max)),                                 # biases
                    resident((gene_p, path_p)),                           # masked w1
                    resident((path_p, hid_p)),                            # w2
                    resident((hid_p, out_p)),                             # w3
                ],
                out_specs=pl.BlockSpec((b_tile, out_p), lambda b, k: (b, 0)),
                scratch_shapes=[pltpu.VMEM((b_tile, gene_p), jnp.float32)],
            ),
            compiler_params=pltpu.CompilerParams(
                dimension_semantics=("parallel", "arbitrary"),
                vmem_limit_bytes=prepared["vmem_limit"],
            ),
        )(xp, prepared["w0"], prepared["bias"], prepared["w1"],
          prepared["w2"], prepared["w3"])

    try:
        out_padded = run(True)
    except Exception:
        # pl.Buffered(1) not supported on this JAX/backend combination; fall
        # back to default double-buffering (correctness unchanged).
        out_padded = run(False)

    return out_padded[:B, :d["out"]]


def pasnet_forward(x, params, gene_mask, pathway_mask, *,
                   param_dtype=jnp.bfloat16, b_tile=None, k_tile=None):
    """Convenience one-shot wrapper (prepare + apply).  In production, call
    prepare_pasnet_params() once at model load and reuse its result."""
    prepared = prepare_pasnet_params(params, gene_mask, pathway_mask,
                                     param_dtype=param_dtype, k_tile=k_tile)
    return pasnet_apply(prepared, x, b_tile=b_tile)


def reference_forward(x, params, gene_mask, pathway_mask):
    """Pure-JAX reference mirroring the PyTorch forward (eval mode)."""
    w0 = params["w0"] * gene_mask
    w1 = params["w1"] * pathway_mask
    h = jax.nn.sigmoid(x @ w0.T + params["b0"])
    h = jax.nn.sigmoid(h @ w1.T + params["b1"])
    h = jax.nn.sigmoid(h @ params["w2"].T + params["b2"])
    logits = h @ params["w3"].T + params["b3"]
    return jax.nn.softmax(logits, axis=1)


if __name__ == "__main__":
    # Small shapes consistent with the module's forward.
    B = 8
    In_Nodes, Gene_Nodes, Pathway_Nodes, Hidden_Nodes, Out_Nodes = 32, 32, 16, 16, 8

    key = jax.random.PRNGKey(0)
    keys = jax.random.split(key, 11)

    def init_linear(kw, kb, out_f, in_f):
        # PyTorch nn.Linear default init: U(-1/sqrt(in_f), 1/sqrt(in_f))
        bound = 1.0 / jnp.sqrt(in_f)
        w = jax.random.uniform(kw, (out_f, in_f), jnp.float32, -bound, bound)
        b = jax.random.uniform(kb, (out_f,), jnp.float32, -bound, bound)
        return w, b

    w0, b0 = init_linear(keys[0], keys[1], Gene_Nodes, In_Nodes)
    w1, b1 = init_linear(keys[2], keys[3], Pathway_Nodes, Gene_Nodes)
    w2, b2 = init_linear(keys[4], keys[5], Hidden_Nodes, Pathway_Nodes)
    w3, b3 = init_linear(keys[6], keys[7], Out_Nodes, Hidden_Nodes)
    params = dict(w0=w0, b0=b0, w1=w1, b1=b1, w2=w2, b2=b2, w3=w3, b3=b3)

    # Deterministic binary masks (sparse connectivity), PyTorch weight layout.
    gene_mask = jax.random.bernoulli(
        keys[8], 0.5, (Gene_Nodes, In_Nodes)).astype(jnp.float32)
    pathway_mask = jax.random.bernoulli(
        keys[9], 0.5, (Pathway_Nodes, Gene_Nodes)).astype(jnp.float32)

    x = jax.random.normal(keys[10], (B, In_Nodes), jnp.float32)

    ref = reference_forward(x, params, gene_mask, pathway_mask)

    # f32 path: strict check (exact softmax normalization -> rows sum to 1).
    prep_f32 = prepare_pasnet_params(params, gene_mask, pathway_mask,
                                     param_dtype=jnp.float32)
    out_f32 = jax.block_until_ready(pasnet_apply(prep_f32, x))
    assert out_f32.shape == (B, Out_Nodes)
    assert jnp.allclose(out_f32, ref, atol=1e-3, rtol=1e-3), "f32 mismatch vs reference"
    assert jnp.allclose(jnp.sum(out_f32, axis=1), jnp.ones((B,)),
                        atol=1e-3), "f32 rows do not sum to 1"

    # bf16 default path (half HBM/VMEM on the dominant w0 stream; f32 accum).
    prep_bf16 = prepare_pasnet_params(params, gene_mask, pathway_mask)
    out_bf16 = jax.block_until_ready(pasnet_apply(prep_bf16, x))
    assert out_bf16.shape == (B, Out_Nodes)
    assert jnp.allclose(out_bf16, ref, atol=5e-2), "bf16 mismatch vs reference"
    assert jnp.allclose(jnp.sum(out_bf16, axis=1), jnp.ones((B,)),
                        atol=1e-3), "bf16 rows do not sum to 1"

    print("KERNEL_OK")
</pallas_src>

<mosaic_0001>
module attributes {stable_mosaic.version = 11 : i64} {
  func.func @kernel(%arg0: i32, %arg1: i32, %arg2: memref<8x128xf32, #tpu.memory_space<vmem>>, %arg3: memref<128x128xf32, #tpu.memory_space<vmem>>, %arg4: memref<4x128xf32, #tpu.memory_space<vmem>>, %arg5: memref<128x128xf32, #tpu.memory_space<vmem>>, %arg6: memref<128x128xf32, #tpu.memory_space<vmem>>, %arg7: memref<128x128xf32, #tpu.memory_space<vmem>>, %arg8: memref<8x128xf32, #tpu.memory_space<vmem>>, %arg9: memref<8x128xf32, #tpu.memory_space<vmem>>) attributes {dimension_semantics = [#tpu.dimension_semantics<parallel>, #tpu.dimension_semantics<arbitrary>], iteration_bounds = array<i64: 1, 1>, scalar_prefetch = 0 : i64, scratch_operands = 1 : i64, tpu.core_type = #tpu.core_type<tc>, window_params = [{transform_indices = @transform_0, window_bounds = array<i64: 8, 128>}, {transform_indices = @transform_1, window_bounds = array<i64: 128, 128>}, {pipeline_mode = #tpu.pipeline_mode<synchronous>, transform_indices = @transform_2, window_bounds = array<i64: 4, 128>}, {pipeline_mode = #tpu.pipeline_mode<synchronous>, transform_indices = @transform_3, window_bounds = array<i64: 128, 128>}, {pipeline_mode = #tpu.pipeline_mode<synchronous>, transform_indices = @transform_4, window_bounds = array<i64: 128, 128>}, {pipeline_mode = #tpu.pipeline_mode<synchronous>, transform_indices = @transform_5, window_bounds = array<i64: 128, 128>}, {transform_indices = @transform_6, window_bounds = array<i64: 8, 128>}]} {
    %c0_i32 = arith.constant 0 : i32
    %0 = arith.cmpi eq, %arg1, %c0_i32 : i32
    %1 = arith.extui %0 : i1 to i32
    %c0_i32_0 = arith.constant 0 : i32
    %2 = arith.cmpi ne, %1, %c0_i32_0 : i32
    scf.if %2 {
      %cst_10 = arith.constant 0.000000e+00 : f32
      %12 = vector.broadcast %cst_10 : f32 to vector<8x128xf32>
      %c0_11 = arith.constant 0 : index
      %c0_12 = arith.constant 0 : index
      %13 = vector.load %arg9[%c0_11, %c0_12] : memref<8x128xf32, #tpu.memory_space<vmem>>, vector<8x128xf32>
      tpu.vector_store %arg9[%c0_11, %c0_12], %12 {strides = array<i32>} : memref<8x128xf32, #tpu.memory_space<vmem>>, vector<8x128xf32>,
    } else {
    }
    %c0 = arith.constant 0 : index
    %c0_1 = arith.constant 0 : index
    %3 = vector.load %arg9[%c0, %c0_1] : memref<8x128xf32, #tpu.memory_space<vmem>>, vector<8x128xf32>
    %c0_2 = arith.constant 0 : index
    %c0_3 = arith.constant 0 : index
    %4 = vector.load %arg2[%c0_2, %c0_3] : memref<8x128xf32, #tpu.memory_space<vmem>>, vector<8x128xf32>
    %c0_4 = arith.constant 0 : index
    %c0_5 = arith.constant 0 : index
    %5 = vector.load %arg3[%c0_4, %c0_5] : memref<128x128xf32, #tpu.memory_space<vmem>>, vector<128x128xf32>
    %cst = arith.constant dense<0.000000e+00> : vector<8x128xf32>
    %6 = tpu.matmul %4, %5, %cst {dimension_numbers = #tpu.dot_dimension_numbers<[1], [0], [0], [1], [0, 0, 1, 1], [], []>} : vector<8x128xf32>, vector<128x128xf32>, vector<8x128xf32> -> vector<8x128xf32>
    %7 = arith.addf %3, %6 : vector<8x128xf32>
    %c0_6 = arith.constant 0 : index
    %c0_7 = arith.constant 0 : index
    %8 = vector.load %arg9[%c0_6, %c0_7] : memref<8x128xf32, #tpu.memory_space<vmem>>, vector<8x128xf32>
    tpu.vector_store %arg9[%c0_6, %c0_7], %7 {strides = array<i32>} : memref<8x128xf32, #tpu.memory_space<vmem>>, vector<8x128xf32>,
    %c0_i32_8 = arith.constant 0 : i32
    %9 = arith.cmpi eq, %arg1, %c0_i32_8 : i32
    %10 = arith.extui %9 : i1 to i32
    %c0_i32_9 = arith.constant 0 : i32
    %11 = arith.cmpi ne, %10, %c0_i32_9 : i32
    scf.if %11 {
      %c0_10 = arith.constant 0 : index
      %c0_11 = arith.constant 0 : index
      %12 = vector.load %arg4[%c0_10, %c0_11] : memref<4x128xf32, #tpu.memory_space<vmem>>, vector<4x128xf32>
      %13 = vector.extract_strided_slice %12 {offsets = [0, 0], sizes = [1, 128], strides = [1, 1]} : vector<4x128xf32> to vector<1x128xf32>
      %14 = vector.extract_strided_slice %12 {offsets = [1, 0], sizes = [1, 128], strides = [1, 1]} : vector<4x128xf32> to vector<1x128xf32>
      %15 = vector.extract_strided_slice %12 {offsets = [2, 0], sizes = [1, 128], strides = [1, 1]} : vector<4x128xf32> to vector<1x128xf32>
      %16 = vector.extract_strided_slice %12 {offsets = [3, 0], sizes = [1, 128], strides = [1, 1]} : vector<4x128xf32> to vector<1x128xf32>
      %c0_12 = arith.constant 0 : index
      %c0_13 = arith.constant 0 : index
      %17 = vector.load %arg9[%c0_12, %c0_13] : memref<8x128xf32, #tpu.memory_space<vmem>>, vector<8x128xf32>
      %18 = vector.broadcast %13 : vector<1x128xf32> to vector<8x128xf32>
      %19 = arith.addf %17, %18 : vector<8x128xf32>
      %20 = arith.negf %19 : vector<8x128xf32>
      %21 = math.exp %20 : vector<8x128xf32>
      %cst_14 = arith.constant 1.000000e+00 : f32
      %22 = vector.broadcast %cst_14 : f32 to vector<8x128xf32>
      %23 = arith.addf %22, %21 : vector<8x128xf32>
      %24 = arith.divf %22, %23 : vector<8x128xf32>
      %c0_15 = arith.constant 0 : index
      %c0_16 = arith.constant 0 : index
      %25 = vector.load %arg5[%c0_15, %c0_16] : memref<128x128xf32, #tpu.memory_space<vmem>>, vector<128x128xf32>
      %cst_17 = arith.constant dense<0.000000e+00> : vector<8x128xf32>
      %26 = tpu.matmul %24, %25, %cst_17 {dimension_numbers = #tpu.dot_dimension_numbers<[1], [0], [0], [1], [0, 0, 1, 1], [], []>} : vector<8x128xf32>, vector<128x128xf32>, vector<8x128xf32> -> vector<8x128xf32>
      %27 = vector.broadcast %14 : vector<1x128xf32> to vector<8x128xf32>
      %28 = arith.addf %26, %27 : vector<8x128xf32>
      %29 = arith.negf %28 : vector<8x128xf32>
      %30 = math.exp %29 : vector<8x128xf32>
      %cst_18 = arith.constant 1.000000e+00 : f32
      %31 = vector.broadcast %cst_18 : f32 to vector<8x128xf32>
      %32 = arith.addf %31, %30 : vector<8x128xf32>
      %33 = arith.divf %31, %32 : vector<8x128xf32>
      %c0_19 = arith.constant 0 : index
      %c0_20 = arith.constant 0 : index
      %34 = vector.load %arg6[%c0_19, %c0_20] : memref<128x128xf32, #tpu.memory_space<vmem>>, vector<128x128xf32>
      %cst_21 = arith.constant dense<0.000000e+00> : vector<8x128xf32>
      %35 = tpu.matmul %33, %34, %cst_21 {dimension_numbers = #tpu.dot_dimension_numbers<[1], [0], [0], [1], [0, 0, 1, 1], [], []>} : vector<8x128xf32>, vector<128x128xf32>, vector<8x128xf32> -> vector<8x128xf32>
      %36 = vector.broadcast %15 : vector<1x128xf32> to vector<8x128xf32>
      %37 = arith.addf %35, %36 : vector<8x128xf32>
      %38 = arith.negf %37 : vector<8x128xf32>
      %39 = math.exp %38 : vector<8x128xf32>
      %cst_22 = arith.constant 1.000000e+00 : f32
      %40 = vector.broadcast %cst_22 : f32 to vector<8x128xf32>
      %41 = arith.addf %40, %39 : vector<8x128xf32>
      %42 = arith.divf %40, %41 : vector<8x128xf32>
      %c0_23 = arith.constant 0 : index
      %c0_24 = arith.constant 0 : index
      %43 = vector.load %arg7[%c0_23, %c0_24] : memref<128x128xf32, #tpu.memory_space<vmem>>, vector<128x128xf32>
      %cst_25 = arith.constant dense<0.000000e+00> : vector<8x128xf32>
      %44 = tpu.matmul %42, %43, %cst_25 {dimension_numbers = #tpu.dot_dimension_numbers<[1], [0], [0], [1], [0, 0, 1, 1], [], []>} : vector<8x128xf32>, vector<128x128xf32>, vector<8x128xf32> -> vector<8x128xf32>
      %45 = vector.broadcast %16 : vector<1x128xf32> to vector<8x128xf32>
      %46 = arith.addf %44, %45 : vector<8x128xf32>
      %cst_26 = arith.constant dense<0xFF800000> : vector<8xf32>
      %47 = vector.multi_reduction <maximumf>, %46, %cst_26 [1] : vector<8x128xf32> to vector<8xf32>
      %48 = vector.shape_cast %47 : vector<8xf32> to vector<8x1xf32>
      %49 = vector.broadcast %48 : vector<8x1xf32> to vector<8x128xf32>
      %50 = arith.subf %46, %49 : vector<8x128xf32>
      %51 = math.exp %50 : vector<8x128xf32>
      %cst_27 = arith.constant dense<0.000000e+00> : vector<8xf32>
      %52 = vector.multi_reduction <add>, %51, %cst_27 [1] : vector<8x128xf32> to vector<8xf32>
      %53 = vector.shape_cast %52 : vector<8xf32> to vector<8x1xf32>
      %cst_28 = arith.constant 1.000000e+00 : f32
      %54 = vector.broadcast %cst_28 : f32 to vector<8x1xf32>
      %55 = arith.divf %54, %53 : vector<8x1xf32>
      %56 = vector.broadcast %55 : vector<8x1xf32> to vector<8x128xf32>
      %57 = arith.mulf %51, %56 : vector<8x128xf32>
      %c0_29 = arith.constant 0 : index
      %c0_30 = arith.constant 0 : index
      %58 = vector.load %arg8[%c0_29, %c0_30] : memref<8x128xf32, #tpu.memory_space<vmem>>, vector<8x128xf32>
      tpu.vector_store %arg8[%c0_29, %c0_30], %57 {strides = array<i32>} : memref<8x128xf32, #tpu.memory_space<vmem>>, vector<8x128xf32>,
    } else {
    }
    return
  }
  func.func @transform_0(%arg0: i32, %arg1: i32) -> (i32, i32) {
    %c0_i32 = arith.constant 0 : i32
    return %arg0, %arg1 : i32, i32
  }
  func.func @transform_1(%arg0: i32, %arg1: i32) -> (i32, i32) {
    %c0_i32 = arith.constant 0 : i32
    %c0_i32_0 = arith.constant 0 : i32
    return %arg1, %c0_i32 : i32, i32
  }
  func.func @transform_2(%arg0: i32, %arg1: i32) -> (i32, i32) {
    %c0_i32 = arith.constant 0 : i32
    %c0_i32_0 = arith.constant 0 : i32
    %c0_i32_1 = arith.constant 0 : i32
    return %c0_i32, %c0_i32_0 : i32, i32
  }
  func.func @transform_3(%arg0: i32, %arg1: i32) -> (i32, i32) {
    %c0_i32 = arith.constant 0 : i32
    %c0_i32_0 = arith.constant 0 : i32
    %c0_i32_1 = arith.constant 0 : i32
    return %c0_i32, %c0_i32_0 : i32, i32
  }
  func.func @transform_4(%arg0: i32, %arg1: i32) -> (i32, i32) {
    %c0_i32 = arith.constant 0 : i32
    %c0_i32_0 = arith.constant 0 : i32
    %c0_i32_1 = arith.constant 0 : i32
    return %c0_i32, %c0_i32_0 : i32, i32
  }
  func.func @transform_5(%arg0: i32, %arg1: i32) -> (i32, i32) {
    %c0_i32 = arith.constant 0 : i32
    %c0_i32_0 = arith.constant 0 : i32
    %c0_i32_1 = arith.constant 0 : i32
    return %c0_i32, %c0_i32_0 : i32, i32
  }
  func.func @transform_6(%arg0: i32, %arg1: i32) -> (i32, i32) {
    %c0_i32 = arith.constant 0 : i32
    %c0_i32_0 = arith.constant 0 : i32
    return %arg0, %c0_i32 : i32, i32
  }
}

module attributes {stable_mosaic.version = 11 : i64} {
  func.func @kernel(%arg0: i32, %arg1: i32, %arg2: memref<8x128xf32, #tpu.memory_space<vmem>>, %arg3: memref<128x128xf32, #tpu.memory_space<vmem>>, %arg4: memref<4x128xf32, #tpu.memory_space<vmem>>, %arg5: memref<128x128xf32, #tpu.memory_space<vmem>>, %arg6: memref<128x128xf32, #tpu.memory_space<vmem>>, %arg7: memref<128x128xf32, #tpu.memory_space<vmem>>, %arg8: memref<8x128xf32, #tpu.memory_space<vmem>>, %arg9: memref<8x128xf32, #tpu.memory_space<vmem>>) attributes {dimension_semantics = [#tpu.dimension_semantics<parallel>, #tpu.dimension_semantics<arbitrary>], iteration_bounds = array<i64: 1, 1>, scalar_prefetch = 0 : i64, scratch_operands = 1 : i64, tpu.core_type = #tpu.core_type<tc>, window_params = [{transform_indices = @transform_0, window_bounds = array<i64: 8, 128>}, {transform_indices = @transform_1, window_bounds = array<i64: 128, 128>}, {pipeline_mode = #tpu.pipeline_mode<synchronous>, transform_indices = @transform_2, window_bounds = array<i64: 4, 128>}, {pipeline_mode = #tpu.pipeline_mode<synchronous>, transform_indices = @transform_3, window_bounds = array<i64: 128, 128>}, {pipeline_mode = #tpu.pipeline_mode<synchronous>, transform_indices = @transform_4, window_bounds = array<i64: 128, 128>}, {pipeline_mode = #tpu.pipeline_mode<synchronous>, transform_indices = @transform_5, window_bounds = array<i64: 128, 128>}, {transform_indices = @transform_6, window_bounds = array<i64: 8, 128>}]} {
    %c0_i32 = arith.constant 0 : i32
    %0 = arith.cmpi eq, %arg1, %c0_i32 : i32
    %1 = arith.extui %0 : i1 to i32
    %c0_i32_0 = arith.constant 0 : i32
    %2 = arith.cmpi ne, %1, %c0_i32_0 : i32
    scf.if %2 {
      %cst_10 = arith.constant 0.000000e+00 : f32
      %12 = vector.broadcast %cst_10 : f32 to vector<8x128xf32>
      %c0_11 = arith.constant 0 : index
      %c0_12 = arith.constant 0 : index
      %13 = vector.load %arg9[%c0_11, %c0_12] : memref<8x128xf32, #tpu.memory_space<vmem>>, vector<8x128xf32>
      tpu.vector_store %arg9[%c0_11, %c0_12], %12 {strides = array<i32>} : memref<8x128xf32, #tpu.memory_space<vmem>>, vector<8x128xf32>,
    } else {
    }
    %c0 = arith.constant 0 : index
    %c0_1 = arith.constant 0 : index
    %3 = vector.load %arg9[%c0, %c0_1] : memref<8x128xf32, #tpu.memory_space<vmem>>, vector<8x128xf32>
    %c0_2 = arith.constant 0 : index
    %c0_3 = arith.constant 0 : index
    %4 = vector.load %arg2[%c0_2, %c0_3] : memref<8x128xf32, #tpu.memory_space<vmem>>, vector<8x128xf32>
    %c0_4 = arith.constant 0 : index
    %c0_5 = arith.constant 0 : index
    %5 = vector.load %arg3[%c0_4, %c0_5] : memref<128x128xf32, #tpu.memory_space<vmem>>, vector<128x128xf32>
    %cst = arith.constant dense<0.000000e+00> : vector<8x128xf32>
    %6 = tpu.matmul %4, %5, %cst {dimension_numbers = #tpu.dot_dimension_numbers<[1], [0], [0], [1], [0, 0, 1, 1], [], []>} : vector<8x128xf32>, vector<128x128xf32>, vector<8x128xf32> -> vector<8x128xf32>
    %7 = arith.addf %3, %6 : vector<8x128xf32>
    %c0_6 = arith.constant 0 : index
    %c0_7 = arith.constant 0 : index
    %8 = vector.load %arg9[%c0_6, %c0_7] : memref<8x128xf32, #tpu.memory_space<vmem>>, vector<8x128xf32>
    tpu.vector_store %arg9[%c0_6, %c0_7], %7 {strides = array<i32>} : memref<8x128xf32, #tpu.memory_space<vmem>>, vector<8x128xf32>,
    %c0_i32_8 = arith.constant 0 : i32
    %9 = arith.cmpi eq, %arg1, %c0_i32_8 : i32
    %10 = arith.extui %9 : i1 to i32
    %c0_i32_9 = arith.constant 0 : i32
    %11 = arith.cmpi ne, %10, %c0_i32_9 : i32
    scf.if %11 {
      %c0_10 = arith.constant 0 : index
      %c0_11 = arith.constant 0 : index
      %12 = vector.load %arg4[%c0_10, %c0_11] : memref<4x128xf32, #tpu.memory_space<vmem>>, vector<4x128xf32>
      %13 = vector.extract_strided_slice %12 {offsets = [0, 0], sizes = [1, 128], strides = [1, 1]} : vector<4x128xf32> to vector<1x128xf32>
      %14 = vector.extract_strided_slice %12 {offsets = [1, 0], sizes = [1, 128], strides = [1, 1]} : vector<4x128xf32> to vector<1x128xf32>
      %15 = vector.extract_strided_slice %12 {offsets = [2, 0], sizes = [1, 128], strides = [1, 1]} : vector<4x128xf32> to vector<1x128xf32>
      %16 = vector.extract_strided_slice %12 {offsets = [3, 0], sizes = [1, 128], strides = [1, 1]} : vector<4x128xf32> to vector<1x128xf32>
      %c0_12 = arith.constant 0 : index
      %c0_13 = arith.constant 0 : index
      %17 = vector.load %arg9[%c0_12, %c0_13] : memref<8x128xf32, #tpu.memory_space<vmem>>, vector<8x128xf32>
      %18 = vector.broadcast %13 : vector<1x128xf32> to vector<8x128xf32>
      %19 = arith.addf %17, %18 : vector<8x128xf32>
      %20 = arith.negf %19 : vector<8x128xf32>
      %21 = math.exp %20 : vector<8x128xf32>
      %cst_14 = arith.constant 1.000000e+00 : f32
      %22 = vector.broadcast %cst_14 : f32 to vector<8x128xf32>
      %23 = arith.addf %22, %21 : vector<8x128xf32>
      %24 = arith.divf %22, %23 : vector<8x128xf32>
      %c0_15 = arith.constant 0 : index
      %c0_16 = arith.constant 0 : index
      %25 = vector.load %arg5[%c0_15, %c0_16] : memref<128x128xf32, #tpu.memory_space<vmem>>, vector<128x128xf32>
      %cst_17 = arith.constant dense<0.000000e+00> : vector<8x128xf32>
      %26 = tpu.matmul %24, %25, %cst_17 {dimension_numbers = #tpu.dot_dimension_numbers<[1], [0], [0], [1], [0, 0, 1, 1], [], []>} : vector<8x128xf32>, vector<128x128xf32>, vector<8x128xf32> -> vector<8x128xf32>
      %27 = vector.broadcast %14 : vector<1x128xf32> to vector<8x128xf32>
      %28 = arith.addf %26, %27 : vector<8x128xf32>
      %29 = arith.negf %28 : vector<8x128xf32>
      %30 = math.exp %29 : vector<8x128xf32>
      %cst_18 = arith.constant 1.000000e+00 : f32
      %31 = vector.broadcast %cst_18 : f32 to vector<8x128xf32>
      %32 = arith.addf %31, %30 : vector<8x128xf32>
      %33 = arith.divf %31, %32 : vector<8x128xf32>
      %c0_19 = arith.constant 0 : index
      %c0_20 = arith.constant 0 : index
      %34 = vector.load %arg6[%c0_19, %c0_20] : memref<128x128xf32, #tpu.memory_space<vmem>>, vector<128x128xf32>
      %cst_21 = arith.constant dense<0.000000e+00> : vector<8x128xf32>
      %35 = tpu.matmul %33, %34, %cst_21 {dimension_numbers = #tpu.dot_dimension_numbers<[1], [0], [0], [1], [0, 0, 1, 1], [], []>} : vector<8x128xf32>, vector<128x128xf32>, vector<8x128xf32> -> vector<8x128xf32>
      %36 = vector.broadcast %15 : vector<1x128xf32> to vector<8x128xf32>
      %37 = arith.addf %35, %36 : vector<8x128xf32>
      %38 = arith.negf %37 : vector<8x128xf32>
      %39 = math.exp %38 : vector<8x128xf32>
      %cst_22 = arith.constant 1.000000e+00 : f32
      %40 = vector.broadcast %cst_22 : f32 to vector<8x128xf32>
      %41 = arith.addf %40, %39 : vector<8x128xf32>
      %42 = arith.divf %40, %41 : vector<8x128xf32>
      %c0_23 = arith.constant 0 : index
      %c0_24 = arith.constant 0 : index
      %43 = vector.load %arg7[%c0_23, %c0_24] : memref<128x128xf32, #tpu.memory_space<vmem>>, vector<128x128xf32>
      %cst_25 = arith.constant dense<0.000000e+00> : vector<8x128xf32>
      %44 = tpu.matmul %42, %43, %cst_25 {dimension_numbers = #tpu.dot_dimension_numbers<[1], [0], [0], [1], [0, 0, 1, 1], [], []>} : vector<8x128xf32>, vector<128x128xf32>, vector<8x128xf32> -> vector<8x128xf32>
      %45 = vector.broadcast %16 : vector<1x128xf32> to vector<8x128xf32>
      %46 = arith.addf %44, %45 : vector<8x128xf32>
      %cst_26 = arith.constant dense<0xFF800000> : vector<8xf32>
      %47 = vector.multi_reduction <maximumf>, %46, %cst_26 [1] : vector<8x128xf32> to vector<8xf32>
      %48 = vector.shape_cast %47 : vector<8xf32> to vector<8x1xf32>
      %49 = vector.broadcast %48 : vector<8x1xf32> to vector<8x128xf32>
      %50 = arith.subf %46, %49 : vector<8x128xf32>
      %51 = math.exp %50 : vector<8x128xf32>
      %cst_27 = arith.constant dense<0.000000e+00> : vector<8xf32>
      %52 = vector.multi_reduction <add>, %51, %cst_27 [1] : vector<8x128xf32> to vector<8xf32>
      %53 = vector.shape_cast %52 : vector<8xf32> to vector<8x1xf32>
      %cst_28 = arith.constant 1.000000e+00 : f32
      %54 = vector.broadcast %cst_28 : f32 to vector<8x1xf32>
      %55 = arith.divf %54, %53 : vector<8x1xf32>
      %56 = vector.broadcast %55 : vector<8x1xf32> to vector<8x128xf32>
      %57 = arith.mulf %51, %56 : vector<8x128xf32>
      %c0_29 = arith.constant 0 : index
      %c0_30 = arith.constant 0 : index
      %58 = vector.load %arg8[%c0_29, %c0_30] : memref<8x128xf32, #tpu.memory_space<vmem>>, vector<8x128xf32>
      tpu.vector_store %arg8[%c0_29, %c0_30], %57 {strides = array<i32>} : memref<8x128xf32, #tpu.memory_space<vmem>>, vector<8x128xf32>,
    } else {
    }
    return
  }
  func.func @transform_0(%arg0: i32, %arg1: i32) -> (i32, i32) {
    %c0_i32 = arith.constant 0 : i32
    return %arg0, %arg1 : i32, i32
  }
  func.func @transform_1(%arg0: i32, %arg1: i32) -> (i32, i32) {
    %c0_i32 = arith.constant 0 : i32
    %c0_i32_0 = arith.constant 0 : i32
    return %arg1, %c0_i32 : i32, i32
  }
  func.func @transform_2(%arg0: i32, %arg1: i32) -> (i32, i32) {
    %c0_i32 = arith.constant 0 : i32
    %c0_i32_0 = arith.constant 0 : i32
    %c0_i32_1 = arith.constant 0 : i32
    return %c0_i32, %c0_i32_0 : i32, i32
  }
  func.func @transform_3(%arg0: i32, %arg1: i32) -> (i32, i32) {
    %c0_i32 = arith.constant 0 : i32
    %c0_i32_0 = arith.constant 0 : i32
    %c0_i32_1 = arith.constant 0 : i32
    return %c0_i32, %c0_i32_0 : i32, i32
  }
  func.func @transform_4(%arg0: i32, %arg1: i32) -> (i32, i32) {
    %c0_i32 = arith.constant 0 : i32
    %c0_i32_0 = arith.constant 0 : i32
    %c0_i32_1 = arith.constant 0 : i32
    return %c0_i32, %c0_i32_0 : i32, i32
  }
  func.func @transform_5(%arg0: i32, %arg1: i32) -> (i32, i32) {
    %c0_i32 = arith.constant 0 : i32
    %c0_i32_0 = arith.constant 0 : i32
    %c0_i32_1 = arith.constant 0 : i32
    return %c0_i32, %c0_i32_0 : i32, i32
  }
  func.func @transform_6(%arg0: i32, %arg1: i32) -> (i32, i32) {
    %c0_i32 = arith.constant 0 : i32
    %c0_i32_0 = arith.constant 0 : i32
    return %arg0, %c0_i32 : i32, i32
  }
}

</mosaic_0001>

<bundles_post_ra>
// kernel: tpu_custom_call.1
= control target key start
LH: loop header
LB: loop body
LE: loop exit
PB: predicated region body
PF: predicated region fallthrough
CT: control target
= control target key end

     0   :  { %11 = vsyncpa [#allocation4], 0  ;;  %s667_s0 = inlined_call_operand.hbm [shape: f32[8,128], index: 0, kind: input, shape index: {}]   ;;  %s668_s1 = inlined_call_operand.hbm [shape: f32[128,128], index: 1, kind: input, shape index: {}]   ;;  %s669_s2 = inlined_call_operand.hbm [shape: f32[4,128], index: 2, kind: input, shape index: {}]   ;;  %s670_s3 = inlined_call_operand.hbm [shape: f32[128,128], index: 3, kind: input, shape index: {}]   ;;  %s671_s4 = inlined_call_operand.hbm [shape: f32[128,128], index: 4, kind: input, shape index: {}]   ;;  %s672_s5 = inlined_call_operand.hbm [shape: f32[128,128], index: 5, kind: input, shape index: {}]   ;;  %s673_s6 = inlined_call_operand.hbm [shape: f32[8,128], index: 6, kind: output, shape index: {}]  }
   0x1   :  { %12 = vsyncpa [#allocation7], 0 }
   0x2   :  { %13 = vsyncpa [#allocation10], 0 }
   0x3   :  { %14 = vsyncpa [#allocation13], 0  ;;  %s31_s23 = sshll.u32 %s668_s1, 4  ;;  %s32_s23 = int_to_ptr.hbm [resolvable:$true] %s31_s23 }
   0x4   :  { %15 = vsyncpa [#allocation5], 0  ;;  %s584_s24 = smov [#allocation6]   ;;  %s55_s28 = sshll.u32 %s670_s3, 4  ;;  %s56_s28 = int_to_ptr.hbm [resolvable:$true] %s55_s28 }
   0x5   :  { %s33_s25 = sshll.u32 %s584_s24, 4  ;;  %s585_s29 = smov 128   ;;  %s34_s25 = int_to_ptr.vmem [resolvable:$true] %s33_s25 }
   0x6   :  { %s586_s30 = smov 8   ;;  %s587_s7 = smov [#allocation9]  }
   0x7   :  { %39 = dma.hbm_to_vmem [thread:$0]  %s32_s23, 2048, %s34_s25, [#allocation7], %s585_s29, %s585_s29, %s586_s30  }
   0x8   :  { %s57_s8 = sshll.u32 %s587_s7, 4  ;;  %s21_s10 = sshll.u32 %s667_s0, 4  ;;  %s58_s8 = int_to_ptr.vmem [resolvable:$true] %s57_s8  ;;  %s22_s10 = int_to_ptr.hbm [resolvable:$true] %s21_s10 }
   0x9   :  { %63 = dma.hbm_to_vmem [thread:$0]  %s56_s28, 2048, %s58_s8, [#allocation10], %s585_s29, %s585_s29, %s586_s30  }
   0xa   :  { %s45_s12 = sshll.u32 %s669_s2, 4  ;;  %s588_s13 = smov [#allocation3]   ;;  %s46_s12 = int_to_ptr.hbm [resolvable:$true] %s45_s12 }
   0xb   :  { %s23_s14 = sshll.u32 %s588_s13, 4  ;;  %s589_s15 = smov [#allocation8]   ;;  %s24_s14 = int_to_ptr.vmem [resolvable:$true] %s23_s14 }
   0xc   :  { %26 = dma.hbm_to_vmem [thread:$0]  %s22_s10, 128, %s24_s14, [#allocation4]  }
   0xd   :  { %s47_s16 = sshll.u32 %s589_s15, 4  ;;  %s68_s0 = sshll.u32 %s671_s4, 4  ;;  %s48_s16 = int_to_ptr.vmem [resolvable:$true] %s47_s16  ;;  %s69_s0 = int_to_ptr.hbm [resolvable:$true] %s68_s0 }
   0xe   :  { %50 = dma.hbm_to_vmem [thread:$0]  %s46_s12, 64, %s48_s16, [#allocation7]  }
   0xf   :  { %s81_s21 = sshll.u32 %s672_s5, 4  ;;  %s590_s22 = smov [#allocation11]   ;;  %s82_s21 = int_to_ptr.hbm [resolvable:$true] %s81_s21 }
  0x10   :  { %s70_s2 = sshll.u32 %s590_s22, 4  ;;  %s591_s23 = smov [#allocation12]   ;;  %s71_s2 = int_to_ptr.vmem [resolvable:$true] %s70_s2 }
  0x11   :  { %76 = dma.hbm_to_vmem [thread:$0]  %s69_s0, 2048, %s71_s2, [#allocation10], %s585_s29, %s585_s29, %s586_s30  }
  0x12   :  { %s83_s24 = sshll.u32 %s591_s23, 4  ;;  %s84_s24 = int_to_ptr.vmem [resolvable:$true] %s83_s24 }
  0x13   :  { %89 = dma.hbm_to_vmem [thread:$0]  %s82_s21, 2048, %s84_s24, [#allocation13], %s585_s29, %s585_s29, %s586_s30  }
  0x14   :  { %574 = dma.done.wait [#allocation4], 128  }
  0x15   :  { %575 = vsyncadd [#allocation4], 4294967168 }
  0x16   :  { %576 = dma.done.wait [#allocation7], 2112  }
  0x17   :  { %577 = vsyncadd [#allocation7], 4294965184 }
  0x18   :  { %578 = dma.done.wait [#allocation10], 4096  }
  0x19   :  { %579 = vsyncadd [#allocation10], 4294963200 }
  0x1a   :  { %580 = dma.done.wait [#allocation13], 2048  }
  0x1b   :  { %581 = vsyncadd [#allocation13], 4294965248  ;;  %v136_v0 = vld [vmem:[#allocation6 + $0x78] sm:$0xff]  ;;  %v135_v1 = vld [vmem:[#allocation6 + $0x70] sm:$0xff]  ;;  %s592_s4 = smov [#allocation14]   ;;  %s365_s27 = sshll.u32 %s673_s6, 4  ;;  %s366_s27 = int_to_ptr.hbm [resolvable:$true] %s365_s27 }
  0x1c   :  { %137 = vmatpush.msra.mxu0 %v136_v0  ;;  %v134_v2 = vld [vmem:[#allocation6 + $0x68] sm:$0xff]  ;;  %v133_v3 = vld [vmem:[#allocation6 + $0x60] sm:$0xff]  ;;  %v132_v4 = vld [vmem:[#allocation6 + $0x58] sm:$0xff]  ;;  %s363_s5 = sshll.u32 %s592_s4, 4  ;;  %s364_s5 = int_to_ptr.vmem [resolvable:$true] %s363_s5 }
  0x1d   :  { %v131_v5 = vld [vmem:[#allocation6 + $0x50] sm:$0xff]  ;;  %v130_v6 = vld [vmem:[#allocation6 + $0x48] sm:$0xff]  ;;  %v129_v7 = vld [vmem:[#allocation6 + $0x40] sm:$0xff] }
  0x1e   :  { %138 = vmatpush.msra.mxu0 %v135_v1  ;;  %v128_v8 = vld [vmem:[#allocation6 + $0x38] sm:$0xff]  ;;  %v127_v9 = vld [vmem:[#allocation6 + $0x30] sm:$0xff]  ;;  %v126_v10 = vld [vmem:[#allocation6 + $0x28] sm:$0xff] }
  0x1f   :  { %v125_v11 = vld [vmem:[#allocation6 + $0x20] sm:$0xff]  ;;  %v124_v12 = vld [vmem:[#allocation6 + $0x18] sm:$0xff]  ;;  %v123_v13 = vld [vmem:[#allocation6 + $0x10] sm:$0xff] }
  0x20   :  { %139 = vmatpush.msra.mxu0 %v134_v2  ;;  %v122_v14 = vld [vmem:[#allocation6 + $0x8] sm:$0xff]  ;;  %v121_v15 = vld [vmem:[#allocation6] sm:$0xff]  ;;  %v120_v16 = vld [vmem:[#allocation3] sm:$0xff] }
  0x21   :  { %v200_v17 = vld [vmem:[#allocation9 + $0x78] sm:$0xff]  ;;  %v199_v18 = vld [vmem:[#allocation9 + $0x70] sm:$0xff]  ;;  %v198_v19 = vld [vmem:[#allocation9 + $0x68] sm:$0xff] }
  0x22   :  { %140 = vmatpush.msra.mxu0 %v133_v3  ;;  %202 = vmatpush.msra.mxu1 %v200_v17  ;;  %v197_v20 = vld [vmem:[#allocation9 + $0x60] sm:$0xff]  ;;  %v196_v21 = vld [vmem:[#allocation9 + $0x58] sm:$0xff]  ;;  %v195_v22 = vld [vmem:[#allocation9 + $0x50] sm:$0xff] }
  0x23   :  { %v194_v23 = vld [vmem:[#allocation9 + $0x48] sm:$0xff]  ;;  %v193_v24 = vld [vmem:[#allocation9 + $0x40] sm:$0xff]  ;;  %v192_v25 = vld [vmem:[#allocation9 + $0x38] sm:$0xff] }
  0x24   :  { %141 = vmatpush.msra.mxu0 %v132_v4  ;;  %203 = vmatpush.msra.mxu1 %v199_v18  ;;  %v191_v26 = vld [vmem:[#allocation9 + $0x30] sm:$0xff]  ;;  %v190_v27 = vld [vmem:[#allocation9 + $0x28] sm:$0xff]  ;;  %v189_v28 = vld [vmem:[#allocation9 + $0x20] sm:$0xff] }
  0x25   :  { %v188_v29 = vld [vmem:[#allocation9 + $0x18] sm:$0xff]  ;;  %v187_v30 = vld [vmem:[#allocation9 + $0x10] sm:$0xff]  ;;  %v186_v31 = vld [vmem:[#allocation9 + $0x8] sm:$0xff] }
  0x26   :  { %142 = vmatpush.msra.mxu0 %v131_v5  ;;  %204 = vmatpush.msra.mxu1 %v198_v19  ;;  %v658_v32 = vld [vmem:[#allocation8] sm:$0xf]  ;;  %v185_v33 = vld [vmem:[#allocation9] sm:$0xff]  ;;  %v255_v51 = vld [vmem:[#allocation11 + $0x70] sm:$0xff] }
  0x27   :  { %v164_v34 = vperm.slane %v658_v32, 0  ;;  %v256_v50 = vld [vmem:[#allocation11 + $0x78] sm:$0xff]  ;;  %v254_v52 = vld [vmem:[#allocation11 + $0x68] sm:$0xff]  ;;  %v253_v53 = vld [vmem:[#allocation11 + $0x60] sm:$0xff]  ;;  %v201_v2 = vperm.slane %v658_v32, 1 }
  0x28   :  { %143 = vmatpush.msra.mxu0 %v130_v6  ;;  %205 = vmatpush.msra.mxu1 %v197_v20  ;;  %v252_v54 = vld [vmem:[#allocation11 + $0x58] sm:$0xff]  ;;  %v251_v55 = vld [vmem:[#allocation11 + $0x50] sm:$0xff]  ;;  %v250_v56 = vld [vmem:[#allocation11 + $0x48] sm:$0xff] }
  0x29   :  { %258 = vmatpush.msra.mxu2 %v256_v50  ;;  %v249_v57 = vld [vmem:[#allocation11 + $0x40] sm:$0xff]  ;;  %v248_v58 = vld [vmem:[#allocation11 + $0x38] sm:$0xff]  ;;  %v247_v59 = vld [vmem:[#allocation11 + $0x30] sm:$0xff] }
  0x2a   :  { %144 = vmatpush.msra.mxu0 %v129_v7  ;;  %206 = vmatpush.msra.mxu1 %v196_v21  ;;  %v246_v60 = vld [vmem:[#allocation11 + $0x28] sm:$0xff]  ;;  %v245_v61 = vld [vmem:[#allocation11 + $0x20] sm:$0xff]  ;;  %v244_v62 = vld [vmem:[#allocation11 + $0x18] sm:$0xff] }
  0x2b   :  { %259 = vmatpush.msra.mxu2 %v255_v51  ;;  %v243_v63 = vld [vmem:[#allocation11 + $0x10] sm:$0xff]  ;;  %v242_v0 = vld [vmem:[#allocation11 + $0x8] sm:$0xff]  ;;  %v241_v1 = vld [vmem:[#allocation11] sm:$0xff]  ;;  %v313_v51 = vperm.slane %v658_v32, 3 }
  0x2c   :  { %145 = vmatpush.msra.mxu0 %v128_v8  ;;  %207 = vmatpush.msra.mxu1 %v195_v22  ;;  %v312_v18 = vld [vmem:[#allocation12 + $0x78] sm:$0xff]  ;;  %v311_v19 = vld [vmem:[#allocation12 + $0x70] sm:$0xff]  ;;  %v310_v20 = vld [vmem:[#allocation12 + $0x68] sm:$0xff] }
  0x2d   :  { %260 = vmatpush.msra.mxu2 %v254_v52  ;;  %314 = vmatpush.msra.mxu3 %v312_v18  ;;  %v309_v21 = vld [vmem:[#allocation12 + $0x60] sm:$0xff]  ;;  %v308_v22 = vld [vmem:[#allocation12 + $0x58] sm:$0xff] }
  0x2e   :  { %146 = vmatpush.msra.mxu0 %v127_v9  ;;  %208 = vmatpush.msra.mxu1 %v194_v23  ;;  %v307_v23 = vld [vmem:[#allocation12 + $0x50] sm:$0xff] }
  0x2f   :  { %261 = vmatpush.msra.mxu2 %v253_v53  ;;  %315 = vmatpush.msra.mxu3 %v311_v19 }
  0x30   :  { %147 = vmatpush.msra.mxu0 %v126_v10  ;;  %209 = vmatpush.msra.mxu1 %v193_v24  ;;  %v306_v24 = vld [vmem:[#allocation12 + $0x48] sm:$0xff] }
  0x31   :  { %262 = vmatpush.msra.mxu2 %v252_v54  ;;  %316 = vmatpush.msra.mxu3 %v310_v20 }
  0x32   :  { %148 = vmatpush.msra.mxu0 %v125_v11  ;;  %210 = vmatpush.msra.mxu1 %v192_v25  ;;  %v305_v25 = vld [vmem:[#allocation12 + $0x40] sm:$0xff] }
  0x33   :  { %263 = vmatpush.msra.mxu2 %v251_v55  ;;  %317 = vmatpush.msra.mxu3 %v309_v21 }
  0x34   :  { %149 = vmatpush.msra.mxu0 %v124_v12  ;;  %211 = vmatpush.msra.mxu1 %v191_v26  ;;  %v304_v26 = vld [vmem:[#allocation12 + $0x38] sm:$0xff] }
  0x35   :  { %264 = vmatpush.msra.mxu2 %v250_v56  ;;  %318 = vmatpush.msra.mxu3 %v308_v22 }
  0x36   :  { %150 = vmatpush.msra.mxu0 %v123_v13  ;;  %212 = vmatpush.msra.mxu1 %v190_v27  ;;  %v303_v27 = vld [vmem:[#allocation12 + $0x30] sm:$0xff] }
  0x37   :  { %265 = vmatpush.msra.mxu2 %v249_v57  ;;  %319 = vmatpush.msra.mxu3 %v307_v23 }
  0x38   :  { %151 = vmatpush.msra.mxu0 %v122_v14  ;;  %213 = vmatpush.msra.mxu1 %v189_v28  ;;  %v302_v28 = vld [vmem:[#allocation12 + $0x28] sm:$0xff] }
  0x39   :  { %266 = vmatpush.msra.mxu2 %v248_v58  ;;  %320 = vmatpush.msra.mxu3 %v306_v24 }
  0x3a   :  { %152 = vmatpush.msra.mxu0 %v121_v15  ;;  %214 = vmatpush.msra.mxu1 %v188_v29  ;;  %v301_v29 = vld [vmem:[#allocation12 + $0x20] sm:$0xff] }
  0x3b   :  { %153 = vmatmul.f32.vlgmr.msra.gmra.mxu0 %v120_v16  ;;  %267 = vmatpush.msra.mxu2 %v247_v59 }
  0x3c   :  { %215 = vmatpush.msra.mxu1 %v187_v30  ;;  %321 = vmatpush.msra.mxu3 %v305_v25  ;;  %v300_v30 = vld [vmem:[#allocation12 + $0x18] sm:$0xff] }
  0x3d   :  { %268 = vmatpush.msra.mxu2 %v246_v60 }
  0x3e   :  { %216 = vmatpush.msra.mxu1 %v186_v31  ;;  %322 = vmatpush.msra.mxu3 %v304_v26  ;;  %v299_v31 = vld [vmem:[#allocation12 + $0x10] sm:$0xff] }
  0x3f   :  { %269 = vmatpush.msra.mxu2 %v245_v61 }
  0x40   :  { %217 = vmatpush.msra.mxu1 %v185_v33  ;;  %323 = vmatpush.msra.mxu3 %v303_v27  ;;  %v298_v33 = vld [vmem:[#allocation12 + $0x8] sm:$0xff] }
  0x41   :  { %270 = vmatpush.msra.mxu2 %v244_v62 }
  0x42   :  { %324 = vmatpush.msra.mxu3 %v302_v28 }
  0x43   :  { %271 = vmatpush.msra.mxu2 %v243_v63 }
  0x44   :  { %325 = vmatpush.msra.mxu3 %v301_v29 }
  0x45   :  { %272 = vmatpush.msra.mxu2 %v242_v0 }
  0x46   :  { %326 = vmatpush.msra.mxu3 %v300_v30 }
  0x47   :  { %273 = vmatpush.msra.mxu2 %v241_v1 }
  0x48   :  { %327 = vmatpush.msra.mxu3 %v299_v31 }
  0x4a   :  { %328 = vmatpush.msra.mxu3 %v298_v33 }
  0xb8   :  { %v154_v35 = vpop.f32.mrf.mxu0 }
  0xb9   :  { %v165_v36 = vadd.f32 %v164_v34, %v154_v35  ;;  %v297_v34 = vld [vmem:[#allocation12] sm:$0xff]  ;;  %v257_v35 = vperm.slane %v658_v32, 2 }
  0xba   :  { %329 = vmatpush.msra.mxu3 %v297_v34 }
  0xbb   :  { %v378_v37 = vmul.f32 -1.442695, %v165_v36 }
  0xbd   :  { %390 = vpow2.f32 %v378_v37 }
  0xc3   :  { %v391_v38 = vpop.eup %390 }
  0xc4   :  { %v169_v39 = vadd.f32 1.0, %v391_v38 }
  0xc6   :  { %392 = vrcp.f32 %v169_v39  ;;  %v181_v43 = vand.u32 2147483648, %v169_v39  ;;  %v179_v45 = vand.u32 2147483647, %v169_v39  ;;  %vm175_vm1 = vweird.f32 %v169_v39 }
  0xc8   :  { %v182_v47 = vor.u32 1.1754944e-38, %v181_v43  ;;  %vm180_vm3 = vcmp.eq.f32.partialorder %v179_v45, 8.507059e+37 }
  0xcc   :  { %v393_v40 = vpop.eup %392 }
  0xcd   :  { %v171_v41 = vmul.f32 %v393_v40, %v169_v39  ;;  %vm176_vm0 = vweird.f32 %v393_v40 }
  0xce   :  { %vm177_vm2 = vmor %vm175_vm1, %vm176_vm0 }
  0xcf   :  { %v172_v42 = vsub.f32 1.0, %v171_v41 }
  0xd1   :  { %v173_v44 = vmul.f32 %v393_v40, %v172_v42 }
  0xd3   :  { %v174_v46 = vadd.f32 %v393_v40, %v173_v44 }
  0xd5   :  { %v178_v48 = vsel %vm177_vm2, %v393_v40, %v174_v46 }
  0xd6   :  { %v183_v49 = vsel %vm180_vm3, %v182_v47, %v178_v48 }
  0xd7   :  { %218 = vmatmul.f32.vlgmr.msra.gmra.mxu1 %v183_v49 }
 0x154   :  { %v219_v3 = vpop.f32.mrf.mxu1 }
 0x155   :  { %v220_v4 = vadd.f32 %v219_v3, %v201_v2 }
 0x157   :  { %v379_v5 = vmul.f32 -1.442695, %v220_v4 }
 0x159   :  { %394 = vpow2.f32 %v379_v5 }
 0x15f   :  { %v395_v6 = vpop.eup %394 }
 0x160   :  { %v225_v7 = vadd.f32 1.0, %v395_v6 }
 0x162   :  { %396 = vrcp.f32 %v225_v7  ;;  %v237_v11 = vand.u32 2147483648, %v225_v7  ;;  %v235_v13 = vand.u32 2147483647, %v225_v7  ;;  %vm231_vm5 = vweird.f32 %v225_v7 }
 0x164   :  { %v238_v15 = vor.u32 1.1754944e-38, %v237_v11  ;;  %vm236_vm7 = vcmp.eq.f32.partialorder %v235_v13, 8.507059e+37 }
 0x168   :  { %v397_v8 = vpop.eup %396 }
 0x169   :  { %v227_v9 = vmul.f32 %v397_v8, %v225_v7  ;;  %vm232_vm4 = vweird.f32 %v397_v8 }
 0x16a   :  { %vm233_vm6 = vmor %vm231_vm5, %vm232_vm4 }
 0x16b   :  { %v228_v10 = vsub.f32 1.0, %v227_v9 }
 0x16d   :  { %v229_v12 = vmul.f32 %v397_v8, %v228_v10 }
 0x16f   :  { %v230_v14 = vadd.f32 %v397_v8, %v229_v12 }
 0x171   :  { %v234_v16 = vsel %vm233_vm6, %v397_v8, %v230_v14 }
 0x172   :  { %v239_v17 = vsel %vm236_vm7, %v238_v15, %v234_v16 }
 0x173   :  { %274 = vmatmul.f32.vlgmr.msra.gmra.mxu2 %v239_v17 }
 0x1f6   :  { %v275_v36 = vpop.f32.mrf.mxu2 }
 0x1f7   :  { %v276_v37 = vadd.f32 %v275_v36, %v257_v35 }
 0x1f9   :  { %v380_v38 = vmul.f32 -1.442695, %v276_v37 }
 0x1fb   :  { %398 = vpow2.f32 %v380_v38 }
 0x201   :  { %v399_v39 = vpop.eup %398 }
 0x202   :  { %v281_v40 = vadd.f32 1.0, %v399_v39 }
 0x204   :  { %400 = vrcp.f32 %v281_v40  ;;  %v293_v44 = vand.u32 2147483648, %v281_v40  ;;  %v291_v46 = vand.u32 2147483647, %v281_v40  ;;  %vm287_vm9 = vweird.f32 %v281_v40 }
 0x206   :  { %v294_v48 = vor.u32 1.1754944e-38, %v293_v44  ;;  %vm292_vm11 = vcmp.eq.f32.partialorder %v291_v46, 8.507059e+37 }
 0x20a   :  { %v401_v41 = vpop.eup %400 }
 0x20b   :  { %v283_v42 = vmul.f32 %v401_v41, %v281_v40  ;;  %vm288_vm8 = vweird.f32 %v401_v41 }
 0x20c   :  { %vm289_vm10 = vmor %vm287_vm9, %vm288_vm8 }
 0x20d   :  { %v284_v43 = vsub.f32 1.0, %v283_v42 }
 0x20f   :  { %v285_v45 = vmul.f32 %v401_v41, %v284_v43 }
 0x211   :  { %v286_v47 = vadd.f32 %v401_v41, %v285_v45 }
 0x213   :  { %v290_v49 = vsel %vm289_vm10, %v401_v41, %v286_v47 }
 0x214   :  { %v295_v50 = vsel %vm292_vm11, %v294_v48, %v290_v49 }
 0x215   :  { %330 = vmatmul.f32.vlgmr.msra.gmra.mxu3 %v295_v50 }
 0x298   :  { %v331_v52 = vpop.f32.mrf.mxu3 }
 0x299   :  { %v332_v53 = vadd.f32 %v331_v52, %v313_v51 }
 0x29b   :  { %334 = vmax.xlane.f32.xlu0 %v332_v53 }
 0x30e   :  { %v335_v54 = vpop.xlane.xlu0 %334 }
 0x30f   :  { %v336_v55 = vsub.f32 %v332_v53, %v335_v54 }
 0x311   :  { %v337_v56 = vmul.f32 1.442695, %v336_v55 }
 0x313   :  { %402 = vpow2.f32 %v337_v56 }
 0x319   :  { %v403_v57 = vpop.eup %402 }
 0x31a   :  { %339 = vadd.xlane.f32.xlu0 %v403_v57 }
 0x38d   :  { %v340_v58 = vpop.xlane.xlu0 %339 }
 0x38e   :  { %404 = vrcp.f32 %v340_v58  ;;  %v352_v62 = vand.u32 2147483648, %v340_v58  ;;  %v350_v0 = vand.u32 2147483647, %v340_v58  ;;  %vm346_vm13 = vweird.f32 %v340_v58 }
 0x390   :  { %v353_v32 = vor.u32 1.1754944e-38, %v352_v62  ;;  %vm351_vm15 = vcmp.eq.f32.partialorder %v350_v0, 8.507059e+37 }
 0x394   :  { %v405_v59 = vpop.eup %404 }
 0x395   :  { %v342_v60 = vmul.f32 %v405_v59, %v340_v58  ;;  %vm347_vm12 = vweird.f32 %v405_v59 }
 0x396   :  { %vm348_vm14 = vmor %vm346_vm13, %vm347_vm12 }
 0x397   :  { %v343_v61 = vsub.f32 1.0, %v342_v60 }
 0x399   :  { %v344_v63 = vmul.f32 %v405_v59, %v343_v61 }
 0x39b   :  { %v345_v1 = vadd.f32 %v405_v59, %v344_v63 }
 0x39d   :  { %v349_v2 = vsel %vm348_vm14, %v405_v59, %v345_v1 }
 0x39e   :  { %v354_v3 = vsel %vm351_vm15, %v353_v32, %v349_v2 }
 0x39f   :  { %v356_v4 = vmul.f32 %v403_v57, %v354_v3 }
 0x3a1   :  { %357 = vst [vmem:[#allocation14] sm:$0xff] %v356_v4 }
 0x3a2   :  { %368 = dma.vmem_to_hbm [thread:$0]  %s364_s5, 128, %s366_s27, [#allocation5]  }
 0x3a3   :  { %582 = dma.done.wait [#allocation5], 128  }
 0x3a4   :  { %583 = vsyncadd [#allocation5], 4294967168 }
 0x3a5   :  { %373 = vsyncpa [#allocation4], 1 }
 0x3a6   :  { %374 = vsyncpa [#allocation7], 1 }
 0x3a7   :  { %375 = vsyncpa [#allocation10], 1 }
 0x3a8   :  { %376 = vsyncpa [#allocation13], 1 }
 0x3a9   :  { %377 = vsyncpa [#allocation5], 1 }

// kernel: tpu_custom_call.1
= control target key start
LH: loop header
LB: loop body
LE: loop exit
PB: predicated region body
PF: predicated region fallthrough
CT: control target
= control target key end

     0   :  { %11 = vsyncpa [#allocation4], 0  ;;  %s667_s0 = inlined_call_operand.hbm [shape: f32[8,128], index: 0, kind: input, shape index: {}]   ;;  %s668_s1 = inlined_call_operand.hbm [shape: f32[128,128], index: 1, kind: input, shape index: {}]   ;;  %s669_s2 = inlined_call_operand.hbm [shape: f32[4,128], index: 2, kind: input, shape index: {}]   ;;  %s670_s3 = inlined_call_operand.hbm [shape: f32[128,128], index: 3, kind: input, shape index: {}]   ;;  %s671_s4 = inlined_call_operand.hbm [shape: f32[128,128], index: 4, kind: input, shape index: {}]   ;;  %s672_s5 = inlined_call_operand.hbm [shape: f32[128,128], index: 5, kind: input, shape index: {}]   ;;  %s673_s6 = inlined_call_operand.hbm [shape: f32[8,128], index: 6, kind: output, shape index: {}]  }
   0x1   :  { %12 = vsyncpa [#allocation7], 0 }
   0x2   :  { %13 = vsyncpa [#allocation10], 0 }
   0x3   :  { %14 = vsyncpa [#allocation13], 0  ;;  %s31_s23 = sshll.u32 %s668_s1, 4  ;;  %s32_s23 = int_to_ptr.hbm [resolvable:$true] %s31_s23 }
   0x4   :  { %15 = vsyncpa [#allocation5], 0  ;;  %s584_s24 = smov [#allocation6]   ;;  %s55_s28 = sshll.u32 %s670_s3, 4  ;;  %s56_s28 = int_to_ptr.hbm [resolvable:$true] %s55_s28 }
   0x5   :  { %s33_s25 = sshll.u32 %s584_s24, 4  ;;  %s585_s29 = smov 128   ;;  %s34_s25 = int_to_ptr.vmem [resolvable:$true] %s33_s25 }
   0x6   :  { %s586_s30 = smov 8   ;;  %s587_s7 = smov [#allocation9]  }
   0x7   :  { %39 = dma.hbm_to_vmem [thread:$0]  %s32_s23, 2048, %s34_s25, [#allocation7], %s585_s29, %s585_s29, %s586_s30  }
   0x8   :  { %s57_s8 = sshll.u32 %s587_s7, 4  ;;  %s21_s10 = sshll.u32 %s667_s0, 4  ;;  %s58_s8 = int_to_ptr.vmem [resolvable:$true] %s57_s8  ;;  %s22_s10 = int_to_ptr.hbm [resolvable:$true] %s21_s10 }
   0x9   :  { %63 = dma.hbm_to_vmem [thread:$0]  %s56_s28, 2048, %s58_s8, [#allocation10], %s585_s29, %s585_s29, %s586_s30  }
   0xa   :  { %s45_s12 = sshll.u32 %s669_s2, 4  ;;  %s588_s13 = smov [#allocation3]   ;;  %s46_s12 = int_to_ptr.hbm [resolvable:$true] %s45_s12 }
   0xb   :  { %s23_s14 = sshll.u32 %s588_s13, 4  ;;  %s589_s15 = smov [#allocation8]   ;;  %s24_s14 = int_to_ptr.vmem [resolvable:$true] %s23_s14 }
   0xc   :  { %26 = dma.hbm_to_vmem [thread:$0]  %s22_s10, 128, %s24_s14, [#allocation4]  }
   0xd   :  { %s47_s16 = sshll.u32 %s589_s15, 4  ;;  %s68_s0 = sshll.u32 %s671_s4, 4  ;;  %s48_s16 = int_to_ptr.vmem [resolvable:$true] %s47_s16  ;;  %s69_s0 = int_to_ptr.hbm [resolvable:$true] %s68_s0 }
   0xe   :  { %50 = dma.hbm_to_vmem [thread:$0]  %s46_s12, 64, %s48_s16, [#allocation7]  }
   0xf   :  { %s81_s21 = sshll.u32 %s672_s5, 4  ;;  %s590_s22 = smov [#allocation11]   ;;  %s82_s21 = int_to_ptr.hbm [resolvable:$true] %s81_s21 }
  0x10   :  { %s70_s2 = sshll.u32 %s590_s22, 4  ;;  %s591_s23 = smov [#allocation12]   ;;  %s71_s2 = int_to_ptr.vmem [resolvable:$true] %s70_s2 }
  0x11   :  { %76 = dma.hbm_to_vmem [thread:$0]  %s69_s0, 2048, %s71_s2, [#allocation10], %s585_s29, %s585_s29, %s586_s30  }
  0x12   :  { %s83_s24 = sshll.u32 %s591_s23, 4  ;;  %s84_s24 = int_to_ptr.vmem [resolvable:$true] %s83_s24 }
  0x13   :  { %89 = dma.hbm_to_vmem [thread:$0]  %s82_s21, 2048, %s84_s24, [#allocation13], %s585_s29, %s585_s29, %s586_s30  }
  0x14   :  { %574 = dma.done.wait [#allocation4], 128  }
  0x15   :  { %575 = vsyncadd [#allocation4], 4294967168 }
  0x16   :  { %576 = dma.done.wait [#allocation7], 2112  }
  0x17   :  { %577 = vsyncadd [#allocation7], 4294965184 }
  0x18   :  { %578 = dma.done.wait [#allocation10], 4096  }
  0x19   :  { %579 = vsyncadd [#allocation10], 4294963200 }
  0x1a   :  { %580 = dma.done.wait [#allocation13], 2048  }
  0x1b   :  { %581 = vsyncadd [#allocation13], 4294965248  ;;  %v136_v0 = vld [vmem:[#allocation6 + $0x78] sm:$0xff]  ;;  %v135_v1 = vld [vmem:[#allocation6 + $0x70] sm:$0xff]  ;;  %s592_s4 = smov [#allocation14]   ;;  %s365_s27 = sshll.u32 %s673_s6, 4  ;;  %s366_s27 = int_to_ptr.hbm [resolvable:$true] %s365_s27 }
  0x1c   :  { %137 = vmatpush.msra.mxu0 %v136_v0  ;;  %v134_v2 = vld [vmem:[#allocation6 + $0x68] sm:$0xff]  ;;  %v133_v3 = vld [vmem:[#allocation6 + $0x60] sm:$0xff]  ;;  %v132_v4 = vld [vmem:[#allocation6 + $0x58] sm:$0xff]  ;;  %s363_s5 = sshll.u32 %s592_s4, 4  ;;  %s364_s5 = int_to_ptr.vmem [resolvable:$true] %s363_s5 }
  0x1d   :  { %v131_v5 = vld [vmem:[#allocation6 + $0x50] sm:$0xff]  ;;  %v130_v6 = vld [vmem:[#allocation6 + $0x48] sm:$0xff]  ;;  %v129_v7 = vld [vmem:[#allocation6 + $0x40] sm:$0xff] }
  0x1e   :  { %138 = vmatpush.msra.mxu0 %v135_v1  ;;  %v128_v8 = vld [vmem:[#allocation6 + $0x38] sm:$0xff]  ;;  %v127_v9 = vld [vmem:[#allocation6 + $0x30] sm:$0xff]  ;;  %v126_v10 = vld [vmem:[#allocation6 + $0x28] sm:$0xff] }
  0x1f   :  { %v125_v11 = vld [vmem:[#allocation6 + $0x20] sm:$0xff]  ;;  %v124_v12 = vld [vmem:[#allocation6 + $0x18] sm:$0xff]  ;;  %v123_v13 = vld [vmem:[#allocation6 + $0x10] sm:$0xff] }
  0x20   :  { %139 = vmatpush.msra.mxu0 %v134_v2  ;;  %v122_v14 = vld [vmem:[#allocation6 + $0x8] sm:$0xff]  ;;  %v121_v15 = vld [vmem:[#allocation6] sm:$0xff]  ;;  %v120_v16 = vld [vmem:[#allocation3] sm:$0xff] }
  0x21   :  { %v200_v17 = vld [vmem:[#allocation9 + $0x78] sm:$0xff]  ;;  %v199_v18 = vld [vmem:[#allocation9 + $0x70] sm:$0xff]  ;;  %v198_v19 = vld [vmem:[#allocation9 + $0x68] sm:$0xff] }
  0x22   :  { %140 = vmatpush.msra.mxu0 %v133_v3  ;;  %202 = vmatpush.msra.mxu1 %v200_v17  ;;  %v197_v20 = vld [vmem:[#allocation9 + $0x60] sm:$0xff]  ;;  %v196_v21 = vld [vmem:[#allocation9 + $0x58] sm:$0xff]  ;;  %v195_v22 = vld [vmem:[#allocation9 + $0x50] sm:$0xff] }
  0x23   :  { %v194_v23 = vld [vmem:[#allocation9 + $0x48] sm:$0xff]  ;;  %v193_v24 = vld [vmem:[#allocation9 + $0x40] sm:$0xff]  ;;  %v192_v25 = vld [vmem:[#allocation9 + $0x38] sm:$0xff] }
  0x24   :  { %141 = vmatpush.msra.mxu0 %v132_v4  ;;  %203 = vmatpush.msra.mxu1 %v199_v18  ;;  %v191_v26 = vld [vmem:[#allocation9 + $0x30] sm:$0xff]  ;;  %v190_v27 = vld [vmem:[#allocation9 + $0x28] sm:$0xff]  ;;  %v189_v28 = vld [vmem:[#allocation9 + $0x20] sm:$0xff] }
  0x25   :  { %v188_v29 = vld [vmem:[#allocation9 + $0x18] sm:$0xff]  ;;  %v187_v30 = vld [vmem:[#allocation9 + $0x10] sm:$0xff]  ;;  %v186_v31 = vld [vmem:[#allocation9 + $0x8] sm:$0xff] }
  0x26   :  { %142 = vmatpush.msra.mxu0 %v131_v5  ;;  %204 = vmatpush.msra.mxu1 %v198_v19  ;;  %v658_v32 = vld [vmem:[#allocation8] sm:$0xf]  ;;  %v185_v33 = vld [vmem:[#allocation9] sm:$0xff]  ;;  %v255_v51 = vld [vmem:[#allocation11 + $0x70] sm:$0xff] }
  0x27   :  { %v164_v34 = vperm.slane %v658_v32, 0  ;;  %v256_v50 = vld [vmem:[#allocation11 + $0x78] sm:$0xff]  ;;  %v254_v52 = vld [vmem:[#allocation11 + $0x68] sm:$0xff]  ;;  %v253_v53 = vld [vmem:[#allocation11 + $0x60] sm:$0xff]  ;;  %v201_v2 = vperm.slane %v658_v32, 1 }
  0x28   :  { %143 = vmatpush.msra.mxu0 %v130_v6  ;;  %205 = vmatpush.msra.mxu1 %v197_v20  ;;  %v252_v54 = vld [vmem:[#allocation11 + $0x58] sm:$0xff]  ;;  %v251_v55 = vld [vmem:[#allocation11 + $0x50] sm:$0xff]  ;;  %v250_v56 = vld [vmem:[#allocation11 + $0x48] sm:$0xff] }
  0x29   :  { %258 = vmatpush.msra.mxu2 %v256_v50  ;;  %v249_v57 = vld [vmem:[#allocation11 + $0x40] sm:$0xff]  ;;  %v248_v58 = vld [vmem:[#allocation11 + $0x38] sm:$0xff]  ;;  %v247_v59 = vld [vmem:[#allocation11 + $0x30] sm:$0xff] }
  0x2a   :  { %144 = vmatpush.msra.mxu0 %v129_v7  ;;  %206 = vmatpush.msra.mxu1 %v196_v21  ;;  %v246_v60 = vld [vmem:[#allocation11 + $0x28] sm:$0xff]  ;;  %v245_v61 = vld [vmem:[#allocation11 + $0x20] sm:$0xff]  ;;  %v244_v62 = vld [vmem:[#allocation11 + $0x18] sm:$0xff] }
  0x2b   :  { %259 = vmatpush.msra.mxu2 %v255_v51  ;;  %v243_v63 = vld [vmem:[#allocation11 + $0x10] sm:$0xff]  ;;  %v242_v0 = vld [vmem:[#allocation11 + $0x8] sm:$0xff]  ;;  %v241_v1 = vld [vmem:[#allocation11] sm:$0xff]  ;;  %v313_v51 = vperm.slane %v658_v32, 3 }
  0x2c   :  { %145 = vmatpush.msra.mxu0 %v128_v8  ;;  %207 = vmatpush.msra.mxu1 %v195_v22  ;;  %v312_v18 = vld [vmem:[#allocation12 + $0x78] sm:$0xff]  ;;  %v311_v19 = vld [vmem:[#allocation12 + $0x70] sm:$0xff]  ;;  %v310_v20 = vld [vmem:[#allocation12 + $0x68] sm:$0xff] }
  0x2d   :  { %260 = vmatpush.msra.mxu2 %v254_v52  ;;  %314 = vmatpush.msra.mxu3 %v312_v18  ;;  %v309_v21 = vld [vmem:[#allocation12 + $0x60] sm:$0xff]  ;;  %v308_v22 = vld [vmem:[#allocation12 + $0x58] sm:$0xff] }
  0x2e   :  { %146 = vmatpush.msra.mxu0 %v127_v9  ;;  %208 = vmatpush.msra.mxu1 %v194_v23  ;;  %v307_v23 = vld [vmem:[#allocation12 + $0x50] sm:$0xff] }
  0x2f   :  { %261 = vmatpush.msra.mxu2 %v253_v53  ;;  %315 = vmatpush.msra.mxu3 %v311_v19 }
  0x30   :  { %147 = vmatpush.msra.mxu0 %v126_v10  ;;  %209 = vmatpush.msra.mxu1 %v193_v24  ;;  %v306_v24 = vld [vmem:[#allocation12 + $0x48] sm:$0xff] }
  0x31   :  { %262 = vmatpush.msra.mxu2 %v252_v54  ;;  %316 = vmatpush.msra.mxu3 %v310_v20 }
  0x32   :  { %148 = vmatpush.msra.mxu0 %v125_v11  ;;  %210 = vmatpush.msra.mxu1 %v192_v25  ;;  %v305_v25 = vld [vmem:[#allocation12 + $0x40] sm:$0xff] }
  0x33   :  { %263 = vmatpush.msra.mxu2 %v251_v55  ;;  %317 = vmatpush.msra.mxu3 %v309_v21 }
  0x34   :  { %149 = vmatpush.msra.mxu0 %v124_v12  ;;  %211 = vmatpush.msra.mxu1 %v191_v26  ;;  %v304_v26 = vld [vmem:[#allocation12 + $0x38] sm:$0xff] }
  0x35   :  { %264 = vmatpush.msra.mxu2 %v250_v56  ;;  %318 = vmatpush.msra.mxu3 %v308_v22 }
  0x36   :  { %150 = vmatpush.msra.mxu0 %v123_v13  ;;  %212 = vmatpush.msra.mxu1 %v190_v27  ;;  %v303_v27 = vld [vmem:[#allocation12 + $0x30] sm:$0xff] }
  0x37   :  { %265 = vmatpush.msra.mxu2 %v249_v57  ;;  %319 = vmatpush.msra.mxu3 %v307_v23 }
  0x38   :  { %151 = vmatpush.msra.mxu0 %v122_v14  ;;  %213 = vmatpush.msra.mxu1 %v189_v28  ;;  %v302_v28 = vld [vmem:[#allocation12 + $0x28] sm:$0xff] }
  0x39   :  { %266 = vmatpush.msra.mxu2 %v248_v58  ;;  %320 = vmatpush.msra.mxu3 %v306_v24 }
  0x3a   :  { %152 = vmatpush.msra.mxu0 %v121_v15  ;;  %214 = vmatpush.msra.mxu1 %v188_v29  ;;  %v301_v29 = vld [vmem:[#allocation12 + $0x20] sm:$0xff] }
  0x3b   :  { %153 = vmatmul.f32.vlgmr.msra.gmra.mxu0 %v120_v16  ;;  %267 = vmatpush.msra.mxu2 %v247_v59 }
  0x3c   :  { %215 = vmatpush.msra.mxu1 %v187_v30  ;;  %321 = vmatpush.msra.mxu3 %v305_v25  ;;  %v300_v30 = vld [vmem:[#allocation12 + $0x18] sm:$0xff] }
  0x3d   :  { %268 = vmatpush.msra.mxu2 %v246_v60 }
  0x3e   :  { %216 = vmatpush.msra.mxu1 %v186_v31  ;;  %322 = vmatpush.msra.mxu3 %v304_v26  ;;  %v299_v31 = vld [vmem:[#allocation12 + $0x10] sm:$0xff] }
  0x3f   :  { %269 = vmatpush.msra.mxu2 %v245_v61 }
  0x40   :  { %217 = vmatpush.msra.mxu1 %v185_v33  ;;  %323 = vmatpush.msra.mxu3 %v303_v27  ;;  %v298_v33 = vld [vmem:[#allocation12 + $0x8] sm:$0xff] }
  0x41   :  { %270 = vmatpush.msra.mxu2 %v244_v62 }
  0x42   :  { %324 = vmatpush.msra.mxu3 %v302_v28 }
  0x43   :  { %271 = vmatpush.msra.mxu2 %v243_v63 }
  0x44   :  { %325 = vmatpush.msra.mxu3 %v301_v29 }
  0x45   :  { %272 = vmatpush.msra.mxu2 %v242_v0 }
  0x46   :  { %326 = vmatpush.msra.mxu3 %v300_v30 }
  0x47   :  { %273 = vmatpush.msra.mxu2 %v241_v1 }
  0x48   :  { %327 = vmatpush.msra.mxu3 %v299_v31 }
  0x4a   :  { %328 = vmatpush.msra.mxu3 %v298_v33 }
  0xb8   :  { %v154_v35 = vpop.f32.mrf.mxu0 }
  0xb9   :  { %v165_v36 = vadd.f32 %v164_v34, %v154_v35  ;;  %v297_v34 = vld [vmem:[#allocation12] sm:$0xff]  ;;  %v257_v35 = vperm.slane %v658_v32, 2 }
  0xba   :  { %329 = vmatpush.msra.mxu3 %v297_v34 }
  0xbb   :  { %v378_v37 = vmul.f32 -1.442695, %v165_v36 }
  0xbd   :  { %390 = vpow2.f32 %v378_v37 }
  0xc3   :  { %v391_v38 = vpop.eup %390 }
  0xc4   :  { %v169_v39 = vadd.f32 1.0, %v391_v38 }
  0xc6   :  { %392 = vrcp.f32 %v169_v39  ;;  %v181_v43 = vand.u32 2147483648, %v169_v39  ;;  %v179_v45 = vand.u32 2147483647, %v169_v39  ;;  %vm175_vm1 = vweird.f32 %v169_v39 }
  0xc8   :  { %v182_v47 = vor.u32 1.1754944e-38, %v181_v43  ;;  %vm180_vm3 = vcmp.eq.f32.partialorder %v179_v45, 8.507059e+37 }
  0xcc   :  { %v393_v40 = vpop.eup %392 }
  0xcd   :  { %v171_v41 = vmul.f32 %v393_v40, %v169_v39  ;;  %vm176_vm0 = vweird.f32 %v393_v40 }
  0xce   :  { %vm177_vm2 = vmor %vm175_vm1, %vm176_vm0 }
  0xcf   :  { %v172_v42 = vsub.f32 1.0, %v171_v41 }
  0xd1   :  { %v173_v44 = vmul.f32 %v393_v40, %v172_v42 }
  0xd3   :  { %v174_v46 = vadd.f32 %v393_v40, %v173_v44 }
  0xd5   :  { %v178_v48 = vsel %vm177_vm2, %v393_v40, %v174_v46 }
  0xd6   :  { %v183_v49 = vsel %vm180_vm3, %v182_v47, %v178_v48 }
  0xd7   :  { %218 = vmatmul.f32.vlgmr.msra.gmra.mxu1 %v183_v49 }
 0x154   :  { %v219_v3 = vpop.f32.mrf.mxu1 }
 0x155   :  { %v220_v4 = vadd.f32 %v219_v3, %v201_v2 }
 0x157   :  { %v379_v5 = vmul.f32 -1.442695, %v220_v4 }
 0x159   :  { %394 = vpow2.f32 %v379_v5 }
 0x15f   :  { %v395_v6 = vpop.eup %394 }
 0x160   :  { %v225_v7 = vadd.f32 1.0, %v395_v6 }
 0x162   :  { %396 = vrcp.f32 %v225_v7  ;;  %v237_v11 = vand.u32 2147483648, %v225_v7  ;;  %v235_v13 = vand.u32 2147483647, %v225_v7  ;;  %vm231_vm5 = vweird.f32 %v225_v7 }
 0x164   :  { %v238_v15 = vor.u32 1.1754944e-38, %v237_v11  ;;  %vm236_vm7 = vcmp.eq.f32.partialorder %v235_v13, 8.507059e+37 }
 0x168   :  { %v397_v8 = vpop.eup %396 }
 0x169   :  { %v227_v9 = vmul.f32 %v397_v8, %v225_v7  ;;  %vm232_vm4 = vweird.f32 %v397_v8 }
 0x16a   :  { %vm233_vm6 = vmor %vm231_vm5, %vm232_vm4 }
 0x16b   :  { %v228_v10 = vsub.f32 1.0, %v227_v9 }
 0x16d   :  { %v229_v12 = vmul.f32 %v397_v8, %v228_v10 }
 0x16f   :  { %v230_v14 = vadd.f32 %v397_v8, %v229_v12 }
 0x171   :  { %v234_v16 = vsel %vm233_vm6, %v397_v8, %v230_v14 }
 0x172   :  { %v239_v17 = vsel %vm236_vm7, %v238_v15, %v234_v16 }
 0x173   :  { %274 = vmatmul.f32.vlgmr.msra.gmra.mxu2 %v239_v17 }
 0x1f6   :  { %v275_v36 = vpop.f32.mrf.mxu2 }
 0x1f7   :  { %v276_v37 = vadd.f32 %v275_v36, %v257_v35 }
 0x1f9   :  { %v380_v38 = vmul.f32 -1.442695, %v276_v37 }
 0x1fb   :  { %398 = vpow2.f32 %v380_v38 }
 0x201   :  { %v399_v39 = vpop.eup %398 }
 0x202   :  { %v281_v40 = vadd.f32 1.0, %v399_v39 }
 0x204   :  { %400 = vrcp.f32 %v281_v40  ;;  %v293_v44 = vand.u32 2147483648, %v281_v40  ;;  %v291_v46 = vand.u32 2147483647, %v281_v40  ;;  %vm287_vm9 = vweird.f32 %v281_v40 }
 0x206   :  { %v294_v48 = vor.u32 1.1754944e-38, %v293_v44  ;;  %vm292_vm11 = vcmp.eq.f32.partialorder %v291_v46, 8.507059e+37 }
 0x20a   :  { %v401_v41 = vpop.eup %400 }
 0x20b   :  { %v283_v42 = vmul.f32 %v401_v41, %v281_v40  ;;  %vm288_vm8 = vweird.f32 %v401_v41 }
 0x20c   :  { %vm289_vm10 = vmor %vm287_vm9, %vm288_vm8 }
 0x20d   :  { %v284_v43 = vsub.f32 1.0, %v283_v42 }
 0x20f   :  { %v285_v45 = vmul.f32 %v401_v41, %v284_v43 }
 0x211   :  { %v286_v47 = vadd.f32 %v401_v41, %v285_v45 }
 0x213   :  { %v290_v49 = vsel %vm289_vm10, %v401_v41, %v286_v47 }
 0x214   :  { %v295_v50 = vsel %vm292_vm11, %v294_v48, %v290_v49 }
 0x215   :  { %330 = vmatmul.f32.vlgmr.msra.gmra.mxu3 %v295_v50 }
 0x298   :  { %v331_v52 = vpop.f32.mrf.mxu3 }
 0x299   :  { %v332_v53 = vadd.f32 %v331_v52, %v313_v51 }
 0x29b   :  { %334 = vmax.xlane.f32.xlu0 %v332_v53 }
 0x30e   :  { %v335_v54 = vpop.xlane.xlu0 %334 }
 0x30f   :  { %v336_v55 = vsub.f32 %v332_v53, %v335_v54 }
 0x311   :  { %v337_v56 = vmul.f32 1.442695, %v336_v55 }
 0x313   :  { %402 = vpow2.f32 %v337_v56 }
 0x319   :  { %v403_v57 = vpop.eup %402 }
 0x31a   :  { %339 = vadd.xlane.f32.xlu0 %v403_v57 }
 0x38d   :  { %v340_v58 = vpop.xlane.xlu0 %339 }
 0x38e   :  { %404 = vrcp.f32 %v340_v58  ;;  %v352_v62 = vand.u32 2147483648, %v340_v58  ;;  %v350_v0 = vand.u32 2147483647, %v340_v58  ;;  %vm346_vm13 = vweird.f32 %v340_v58 }
 0x390   :  { %v353_v32 = vor.u32 1.1754944e-38, %v352_v62  ;;  %vm351_vm15 = vcmp.eq.f32.partialorder %v350_v0, 8.507059e+37 }
 0x394   :  { %v405_v59 = vpop.eup %404 }
 0x395   :  { %v342_v60 = vmul.f32 %v405_v59, %v340_v58  ;;  %vm347_vm12 = vweird.f32 %v405_v59 }
 0x396   :  { %vm348_vm14 = vmor %vm346_vm13, %vm347_vm12 }
 0x397   :  { %v343_v61 = vsub.f32 1.0, %v342_v60 }
 0x399   :  { %v344_v63 = vmul.f32 %v405_v59, %v343_v61 }
 0x39b   :  { %v345_v1 = vadd.f32 %v405_v59, %v344_v63 }
 0x39d   :  { %v349_v2 = vsel %vm348_vm14, %v405_v59, %v345_v1 }
 0x39e   :  { %v354_v3 = vsel %vm351_vm15, %v353_v32, %v349_v2 }
 0x39f   :  { %v356_v4 = vmul.f32 %v403_v57, %v354_v3 }
 0x3a1   :  { %357 = vst [vmem:[#allocation14] sm:$0xff] %v356_v4 }
 0x3a2   :  { %368 = dma.vmem_to_hbm [thread:$0]  %s364_s5, 128, %s366_s27, [#allocation5]  }
 0x3a3   :  { %582 = dma.done.wait [#allocation5], 128  }
 0x3a4   :  { %583 = vsyncadd [#allocation5], 4294967168 }
 0x3a5   :  { %373 = vsyncpa [#allocation4], 1 }
 0x3a6   :  { %374 = vsyncpa [#allocation7], 1 }
 0x3a7   :  { %375 = vsyncpa [#allocation10], 1 }
 0x3a8   :  { %376 = vsyncpa [#allocation13], 1 }
 0x3a9   :  { %377 = vsyncpa [#allocation5], 1 }

</bundles_post_ra>
